<compile_context>
chip_gen: v7x
topology: tpu7x:2x2x1
jax: 0.10.0
libtpu: 0.0.40
codegen_flags: <defaults>
</compile_context>

<pallas_src>
import jax
import jax.numpy as jnp
from jax.experimental import pallas as pl
from jax.experimental.pallas import tpu as pltpu


def _pointwise_conv_kernel(x_ref, w_ref, b_ref, o_ref):
    # x_ref: (TM, F)   w_ref: (F, D)   b_ref: (1, D)   o_ref: (TM, D)
    x = x_ref[...].astype(jnp.float32)
    w = w_ref[...].astype(jnp.float32)
    y = jnp.dot(x, w, preferred_element_type=jnp.float32)          # MXU
    o_ref[...] = (y + b_ref[...].astype(jnp.float32)).astype(o_ref.dtype)


def data_embedding_forward(x, weight, bias, *, tile_m=1024):
    """Forward of DataEmbedding: y[b,t,:] = weight @ x[b,t,:] + bias.

    x: (B, S, F) float, weight: (D, F), bias: (D,)  ->  (B, S, D)
    """
    B, S, F = x.shape
    D = weight.shape[0]
    M = B * S

    x2 = x.reshape(M, F)                  # contiguous reshape, no HBM copy
    w_t = jnp.transpose(weight)           # (F, D): contracting dim leading for MXU
    b2 = bias.reshape(1, D)

    # Row-axis tiling: tile_m is a multiple of 8 (sublane) so the (8,128) block
    # constraint is met; for small problems one full-array block is used.
    tm = M if M <= tile_m else tile_m
    grid = (pl.cdiv(M, tm),)

    out2d = pl.pallas_call(
        _pointwise_conv_kernel,
        out_shape=jax.ShapeDtypeStruct((M, D), x.dtype),
        grid_spec=pltpu.PrefetchScalarGridSpec(
            num_scalar_prefetch=0,
            grid=grid,
            in_specs=[
                pl.BlockSpec((tm, F), lambda i: (i, 0)),   # streamed row tiles
                pl.BlockSpec((F, D), lambda i: (0, 0)),    # weight: resident
                pl.BlockSpec((1, D), lambda i: (0, 0)),    # bias: resident
            ],
            out_specs=pl.BlockSpec((tm, D), lambda i: (i, 0)),
        ),
        compiler_params=pltpu.CompilerParams(
            # Rows are independent -> shard grid steps across v7x's 2 TCs
            # (harmless no-op on v5e/v6e single-TC chips).
            dimension_semantics=("parallel",),
        ),
    )(x2, w_t, b2)

    return out2d.reshape(B, S, D)


if __name__ == "__main__":
    # Small shapes consistent with the module: x is (batch, seq, feature_num).
    batch, seq, feature_num, model_dim = 2, 8, 4, 32

    key = jax.random.PRNGKey(0)
    kx, kw, kb = jax.random.split(key, 3)

    x = jax.random.normal(kx, (batch, seq, feature_num), dtype=jnp.float32)

    # Conv1d(kernel_size=1) parameters; kaiming-normal-style scale for the weight
    # and the PyTorch default uniform(-1/sqrt(fan_in), 1/sqrt(fan_in)) bias.
    fan_in = feature_num
    gain = (2.0 / (1.0 + 0.01 ** 2)) ** 0.5          # leaky_relu gain
    w_std = gain / (fan_in ** 0.5)
    weight = w_std * jax.random.normal(kw, (model_dim, feature_num), dtype=jnp.float32)
    b_bound = 1.0 / (fan_in ** 0.5)
    bias = jax.random.uniform(kb, (model_dim,), dtype=jnp.float32,
                              minval=-b_bound, maxval=b_bound)

    out = data_embedding_forward(x, weight, bias)
    jax.block_until_ready(out)

    # Pure-JAX reference: pointwise conv == per-timestep linear projection.
    ref = jnp.einsum("btf,df->btd", x, weight) + bias
    assert out.shape == (batch, seq, model_dim)
    assert jnp.max(jnp.abs(out - ref)) < 1e-4

    print("KERNEL_OK")
</pallas_src>

<mosaic_0001>
module attributes {stable_mosaic.version = 11 : i64} {
  func.func @_pointwise_conv_kernel(%arg0: i32, %arg1: memref<16x4xf32, #tpu.memory_space<vmem>>, %arg2: memref<4x32xf32, #tpu.memory_space<vmem>>, %arg3: memref<1x32xf32, #tpu.memory_space<vmem>>, %arg4: memref<16x32xf32, #tpu.memory_space<vmem>>) attributes {dimension_semantics = [#tpu.dimension_semantics<parallel>], iteration_bounds = array<i64: 1>, scalar_prefetch = 0 : i64, scratch_operands = 0 : i64, tpu.core_type = #tpu.core_type<tc>, window_params = [{transform_indices = @transform_0, window_bounds = array<i64: 16, 4>}, {pipeline_mode = #tpu.pipeline_mode<synchronous>, transform_indices = @transform_1, window_bounds = array<i64: 4, 32>}, {pipeline_mode = #tpu.pipeline_mode<synchronous>, transform_indices = @transform_2, window_bounds = array<i64: 1, 32>}, {transform_indices = @transform_3, window_bounds = array<i64: 16, 32>}]} {
    %c0 = arith.constant 0 : index
    %c0_0 = arith.constant 0 : index
    %0 = vector.load %arg1[%c0, %c0_0] : memref<16x4xf32, #tpu.memory_space<vmem>>, vector<16x4xf32>
    %c0_1 = arith.constant 0 : index
    %c0_2 = arith.constant 0 : index
    %1 = vector.load %arg2[%c0_1, %c0_2] : memref<4x32xf32, #tpu.memory_space<vmem>>, vector<4x32xf32>
    %cst = arith.constant dense<0.000000e+00> : vector<16x32xf32>
    %2 = tpu.matmul %0, %1, %cst {dimension_numbers = #tpu.dot_dimension_numbers<[1], [0], [0], [1], [0, 0, 1, 1], [], []>} : vector<16x4xf32>, vector<4x32xf32>, vector<16x32xf32> -> vector<16x32xf32>
    %c0_3 = arith.constant 0 : index
    %c0_4 = arith.constant 0 : index
    %3 = vector.load %arg3[%c0_3, %c0_4] : memref<1x32xf32, #tpu.memory_space<vmem>>, vector<1x32xf32>
    %4 = vector.broadcast %3 : vector<1x32xf32> to vector<16x32xf32>
    %5 = arith.addf %2, %4 : vector<16x32xf32>
    %c0_5 = arith.constant 0 : index
    %c0_6 = arith.constant 0 : index
    %6 = vector.load %arg4[%c0_5, %c0_6] : memref<16x32xf32, #tpu.memory_space<vmem>>, vector<16x32xf32>
    tpu.vector_store %arg4[%c0_5, %c0_6], %5 {strides = array<i32>} : memref<16x32xf32, #tpu.memory_space<vmem>>, vector<16x32xf32>,
    return
  }
  func.func @transform_0(%arg0: i32) -> (i32, i32) {
    %c0_i32 = arith.constant 0 : i32
    %c0_i32_0 = arith.constant 0 : i32
    return %arg0, %c0_i32 : i32, i32
  }
  func.func @transform_1(%arg0: i32) -> (i32, i32) {
    %c0_i32 = arith.constant 0 : i32
    %c0_i32_0 = arith.constant 0 : i32
    %c0_i32_1 = arith.constant 0 : i32
    return %c0_i32, %c0_i32_0 : i32, i32
  }
  func.func @transform_2(%arg0: i32) -> (i32, i32) {
    %c0_i32 = arith.constant 0 : i32
    %c0_i32_0 = arith.constant 0 : i32
    %c0_i32_1 = arith.constant 0 : i32
    return %c0_i32, %c0_i32_0 : i32, i32
  }
  func.func @transform_3(%arg0: i32) -> (i32, i32) {
    %c0_i32 = arith.constant 0 : i32
    %c0_i32_0 = arith.constant 0 : i32
    return %arg0, %c0_i32 : i32, i32
  }
}

</mosaic_0001>

<bundles_post_ra>
// kernel: tpu_custom_call.1
= control target key start
LH: loop header
LB: loop body
LE: loop exit
PB: predicated region body
PF: predicated region fallthrough
CT: control target
= control target key end

     0   :  { %vm32_vm0 = vcmask 1043456   ;;  %vm25_vm1 = vcmask 31744   ;;  %s216_s0 = inlined_call_operand.vmem [shape: f32[16,4], index: 0, kind: input, shape index: {}]   ;;  %s217_s1 = inlined_call_operand.vmem [shape: f32[4,32], index: 1, kind: input, shape index: {}]   ;;  %s218_s2 = inlined_call_operand.vmem [shape: f32[1,32], index: 2, kind: input, shape index: {}]   ;;  %s219_s3 = inlined_call_operand.hbm [shape: f32[16,32], index: 3, kind: output, shape index: {}]  }
   0x1   :  { %v17_v0 = vld [vmem:[%s217_s1] sm:$0xf]  ;;  %v16_v2 = vld [vmem:[%s216_s0 + $0x8] sm:$0xff] }
   0x2   :  { %v15_v1 = vld [vmem:[%s216_s0] sm:$0xff]  ;;  %137 = vmatprep.subr.msk.mxu0 %vm32_vm0, %v17_v0 }
   0x3   :  { %139 = vmatprep.mubr.msk.f32.mxu0 %vm25_vm1, %v15_v1 }
   0x4   :  { %8 = vsyncpa [#allocation3], 0  ;;  %138 = vmatpush3.msk.msra.mxu0 %vm32_vm0, %v17_v0  ;;  %v130_v3 = vld [vmem:[%s218_s2] ss:$0 sm:$0xff]  ;;  %s169_s1 = smov [#allocation2]   ;;  %vm111_vm2 = vcmask 261120  }
   0x5   :  { %140 = vmatmul.mubr.msk.f32.vlgmr.msra.gmra.mrb[0].mxu0 %vm25_vm1, %v16_v2  ;;  %s119_s20 = sshll.u32 %s169_s1, 4  ;;  %s120_s20 = int_to_ptr.vmem [resolvable:$true] %s119_s20 }
   0x6   :  { %s145_s0 = scalar_lea.vmem %s120_s20, 256  ;;  %p150_p1 = scmp.lt.s32.totalorder %s120_s20, %s120_s20 }
   0x7   :  { %p146_p0 = scmp.ne.s32.totalorder %s120_s20, %s145_s0  ;;  %p151_p2 = scmp.lt.s32.totalorder %s145_s0, %s145_s0 }
   0x9   :  { %p152_p3 = por %p151_p2, %p150_p1 }
   0xb   :  { %p153_p4 = pnand %p152_p3, %p146_p0 }
  0xd8   :  { %v141_v4 = vpop.f32.mrb[0].mxu0 }
  0xd9   :  { %v108_v5 = vadd.f32 %v141_v4, %v130_v3  ;;  %v102_v6 = vpop.f32.mrb[1].mxu0 }
  0xda   :  { %v103_v7 = vadd.f32 %v130_v3, %v102_v6 }
  0xdb   :  { %113 = vst.msk [vmem:[#allocation2 + $0x8] sm:$0xff] %vm111_vm2, %v108_v5 }
  0xdc   :  { %112 = vst.msk [vmem:[#allocation2] sm:$0xff] %vm111_vm2, %v103_v7 }
  0xdd   :  { %156 = shalt.err (!%p153_p4)
}
  0xde   :  { %s157_s2 = scalar_lea.hbm %s219_s3, 256 }
  0xdf   :  { %p158_p5 = scmp.ne.s32.totalorder %s219_s3, %s157_s2  ;;  %p161_p6 = scmp.lt.u32.totalorder %s157_s2, %s219_s3 }
  0xe1   :  { %p163_p7 = pnand %p161_p6, %p158_p5 }
  0xe3   :  { %166 = shalt.err (!%p163_p7)
}
  0xe4   :  { %s170_s27 = smov 128   ;;  %s171_s28 = smov 8  }
  0xe5   :  { %125 = dma.vmem_to_hbm [thread:$0]  %s120_s20, 256, %s219_s3, [#allocation3], %s170_s27, %s170_s27, %s171_s28  }
  0xe6   :  { %167 = dma.done.wait [#allocation3], 256  }
  0xe7   :  { %168 = vsyncadd [#allocation3], 4294967040 }
  0xe8   :  { %129 = vsyncpa [#allocation3], 1 }

</bundles_post_ra>
